<compile_context>
chip_gen: v7x
topology: tpu7x:2x2x1
jax: 0.10.0
libtpu: 0.0.40
codegen_flags: <defaults>
</compile_context>

<pallas_src>
import functools

import jax
import jax.numpy as jnp
from jax.experimental import pallas as pl
from jax.experimental.pallas import tpu as pltpu


# ---------------------------------------------------------------------------
# Pallas kernel: elementwise x * mask (mask broadcasts over lanes when it is
# a (TR, 1) spatial-mask tile; same body handles the (TR, TS) full-mask tile).
# ---------------------------------------------------------------------------
def _vhd_mul_kernel(x_ref, mask_ref, o_ref):
    o_ref[...] = x_ref[...] * mask_ref[...]


def _choose_tiles(R, S, itemsize, target_bytes=1 << 20):
    """Pick (row_tile, lane_tile) giving ~1 MiB lane-dense blocks.

    Row tile is a multiple of the dtype's sublane packing (8 for f32, 16 for
    bf16, 32 for int8/fp8) unless it covers the full row extent.  Lane tile is
    either the full lane extent (always a legal block dim) or a multiple of
    128 (unmasked vld/vst).
    """
    sub = 8 * max(4 // itemsize, 1)
    if sub * S * itemsize <= target_bytes or S < 128:
        ts = S
    else:
        ts = max((target_bytes // (sub * itemsize)) // 128 * 128, 128)
    tr = max((target_bytes // (ts * itemsize)) // sub * sub, sub)
    if tr >= R:
        tr = R
    return tr, ts


@functools.partial(jax.jit, static_argnames=("spatial",), donate_argnums=(0,))
def _apply_mask(x, mask, *, spatial):
    """x: (N, C, H, W); mask: (N, C, 1, 1) if spatial else (N, C, H, W)."""
    N, C, H, W = x.shape
    R = N * C
    S = H * W
    itemsize = jnp.dtype(x.dtype).itemsize

    x2 = x.reshape(R, S)
    tr, ts = _choose_tiles(R, S, itemsize)
    grid = (pl.cdiv(R, tr), pl.cdiv(S, ts))

    x_spec = pl.BlockSpec((tr, ts), lambda i, j: (i, j))
    out_spec = pl.BlockSpec((tr, ts), lambda i, j: (i, j))
    if spatial:
        m2 = mask.reshape(R, 1).astype(x.dtype)
        m_spec = pl.BlockSpec((tr, 1), lambda i, j: (i, 0))
        mask_bytes = R * itemsize
    else:
        # TODO(synk): could generate the non-spatial mask in-kernel with
        # pltpu.prng_seed/prng_random_bits to cut HBM traffic by ~1/3, but
        # that changes the module's mask-caching semantics (reset_mask stores
        # the mask tensor), so we keep the explicit mask read.
        m2 = mask.reshape(R, S).astype(x.dtype)
        m_spec = pl.BlockSpec((tr, ts), lambda i, j: (i, j))
        mask_bytes = R * S * itemsize

    cost = pl.CostEstimate(
        flops=R * S,
        transcendentals=0,
        bytes_accessed=2 * R * S * itemsize + mask_bytes,
    )

    out2 = pl.pallas_call(
        _vhd_mul_kernel,
        out_shape=jax.ShapeDtypeStruct((R, S), x.dtype),
        grid=grid,
        in_specs=[x_spec, m_spec],
        out_specs=out_spec,
        input_output_aliases={0: 0},
        compiler_params=pltpu.CompilerParams(
            dimension_semantics=("parallel", "parallel"),
        ),
        cost_estimate=cost,
    )(x2, m2)

    return out2.reshape(N, C, H, W)


# ---------------------------------------------------------------------------
# Module-equivalent wrapper
# ---------------------------------------------------------------------------
class VariationalHidDropout2d:
    """JAX/Pallas port of the PyTorch VariationalHidDropout2d module."""

    def __init__(self, dropout=0.0, spatial=True):
        self.dropout = dropout
        self.spatial = spatial
        self.mask = None
        self.training = True

    def reset_mask(self, x, key):
        p = self.dropout
        if self.spatial:
            shape = (x.shape[0], x.shape[1], 1, 1)  # (N, C, 1, 1)
        else:
            shape = x.shape
        # bernoulli(1 - p) then divide by (1 - p)  (inverted dropout scaling)
        m = jax.random.bernoulli(key, 1.0 - p, shape).astype(x.dtype)
        self.mask = m / jnp.asarray(1.0 - p, dtype=x.dtype)
        return self.mask

    def __call__(self, x):
        if (not self.training) or self.dropout == 0:
            return x
        assert self.mask is not None, (
            "You need to reset mask before using VariationalHidDropout"
        )
        return _apply_mask(x, self.mask, spatial=self.spatial)


if __name__ == "__main__":
    key = jax.random.PRNGKey(0)
    kx, km, kx2, km2 = jax.random.split(key, 4)

    N, C, H, W = 2, 4, 16, 16
    x = jax.random.normal(kx, (N, C, H, W), dtype=jnp.float32)

    # ---- spatial=True path ----
    mod = VariationalHidDropout2d(dropout=0.25, spatial=True)
    mod.reset_mask(x, km)

    # Eval-mode passthrough (no kernel call, no donation).
    mod.training = False
    out_eval = jax.block_until_ready(mod(x))
    assert jnp.array_equal(out_eval, x)

    # Reference computed BEFORE the kernel call (x is donated to the kernel).
    ref = jax.block_until_ready(x * jnp.broadcast_to(mod.mask, x.shape))

    mod.training = True
    out = jax.block_until_ready(mod(x))  # donates x's buffer
    assert out.shape == (N, C, H, W) and out.dtype == jnp.float32
    assert jnp.allclose(out, ref, atol=1e-6, rtol=1e-6)

    # ---- spatial=False path ----
    x_ns = jax.random.normal(kx2, (N, C, H, W), dtype=jnp.float32)
    mod_ns = VariationalHidDropout2d(dropout=0.5, spatial=False)
    mod_ns.reset_mask(x_ns, km2)
    ref_ns = jax.block_until_ready(x_ns * mod_ns.mask)
    out_ns = jax.block_until_ready(mod_ns(x_ns))  # donates x_ns
    assert jnp.allclose(out_ns, ref_ns, atol=1e-6, rtol=1e-6)

    print("KERNEL_OK")
</pallas_src>

<mosaic_0001>
module attributes {stable_mosaic.version = 11 : i64} {
  func.func @_vhd_mul_kernel(%arg0: i32, %arg1: i32, %arg2: memref<8x256xf32, #tpu.memory_space<vmem>>, %arg3: memref<8x1xf32, #tpu.memory_space<vmem>>, %arg4: memref<8x256xf32, #tpu.memory_space<vmem>>) attributes {dimension_semantics = [#tpu.dimension_semantics<parallel>, #tpu.dimension_semantics<parallel>], iteration_bounds = array<i64: 1, 1>, scalar_prefetch = 0 : i64, scratch_operands = 0 : i64, tpu.core_type = #tpu.core_type<tc>, window_params = [{transform_indices = @transform_0, window_bounds = array<i64: 8, 256>}, {transform_indices = @transform_1, window_bounds = array<i64: 8, 1>}, {transform_indices = @transform_2, window_bounds = array<i64: 8, 256>}]} {
    %c0 = arith.constant 0 : index
    %c0_0 = arith.constant 0 : index
    %0 = vector.load %arg2[%c0, %c0_0] : memref<8x256xf32, #tpu.memory_space<vmem>>, vector<8x256xf32>
    %c0_1 = arith.constant 0 : index
    %c0_2 = arith.constant 0 : index
    %1 = vector.load %arg3[%c0_1, %c0_2] : memref<8x1xf32, #tpu.memory_space<vmem>>, vector<8x1xf32>
    %2 = vector.broadcast %1 : vector<8x1xf32> to vector<8x256xf32>
    %3 = arith.mulf %0, %2 : vector<8x256xf32>
    %c0_3 = arith.constant 0 : index
    %c0_4 = arith.constant 0 : index
    %4 = vector.load %arg4[%c0_3, %c0_4] : memref<8x256xf32, #tpu.memory_space<vmem>>, vector<8x256xf32>
    tpu.vector_store %arg4[%c0_3, %c0_4], %3 {strides = array<i32>} : memref<8x256xf32, #tpu.memory_space<vmem>>, vector<8x256xf32>,
    return
  }
  func.func @transform_0(%arg0: i32, %arg1: i32) -> (i32, i32) {
    %c0_i32 = arith.constant 0 : i32
    return %arg0, %arg1 : i32, i32
  }
  func.func @transform_1(%arg0: i32, %arg1: i32) -> (i32, i32) {
    %c0_i32 = arith.constant 0 : i32
    %c0_i32_0 = arith.constant 0 : i32
    return %arg0, %c0_i32 : i32, i32
  }
  func.func @transform_2(%arg0: i32, %arg1: i32) -> (i32, i32) {
    %c0_i32 = arith.constant 0 : i32
    return %arg0, %arg1 : i32, i32
  }
}

</mosaic_0001>

<bundles_post_ra>
// kernel: _apply_mask.1
= control target key start
LH: loop header
LB: loop body
LE: loop exit
PB: predicated region body
PF: predicated region fallthrough
CT: control target
= control target key end

     0   :  { %v29_v0 = vmov 0   ;;  %s60_s1 = inlined_call_operand.vmem [shape: f32[8,1], index: 1, kind: input, shape index: {}]   ;;  %s61_s0 = inlined_call_operand.vmem [shape: f32[8,256], index: 0, kind: input, shape index: {}, may-alias: {0,2}]   ;;  %s62_s2 = inlined_call_operand.vmem [shape: f32[8,256], index: 2, kind: output, shape index: {}, may-alias: {0,2}]  }
   0x1   :  { %28 = vset.pattern.permute.xlu0 %v29_v0  ;;  %v13_v1 = vld [vmem:[%s60_s1] sm:$0xff]  ;;  %v12_v3 = vld [vmem:[%s61_s0 + $0x8] sm:$0xff] }
   0x2   :  { %16 = vperm.xlu0 %28, %v13_v1   ;;  %v11_v2 = vld [vmem:[%s61_s0] sm:$0xff] }
  0x81   :  { %v17_v4 = vpop.permute.xlu0 %16 }
  0x82   :  { %v19_v5 = vmul.f32 %v17_v4, %v11_v2  ;;  %v20_v6 = vmul.f32 %v17_v4, %v12_v3 }
  0x84   :  { %21 = vst [vmem:[%s62_s2] sm:$0xff] %v19_v5  ;;  %22 = vst [vmem:[%s62_s2 + $0x8] sm:$0xff] %v20_v6 }

</bundles_post_ra>
